<compile_context>
chip_gen: v5e
topology: v5e:2x2
jax: 0.10.0
libtpu: 0.0.40
codegen_flags: <defaults>
</compile_context>

<pallas_src>
import functools

import jax
import jax.numpy as jnp
from jax import lax
from jax.experimental import pallas as pl
from jax.experimental.pallas import tpu as pltpu


def _round_up(x, m):
    return ((x + m - 1) // m) * m


def _cdiv(a, b):
    return -(-a // b)


# --------------------------------------------------------------------------- #
# Kernel 1: streamed spectral projection                                       #
# --------------------------------------------------------------------------- #
def _projection_kernel(etx_ref, ety_ref, fx_ref, fy_ref, a_ref, b_ref, *,
                       v_tile, tiles_per_core, vx, vy):
    """Accumulate A = etx @ fx and B = ety @ fy over V tiles.

    grid = (n_split, tiles_per_core).  a_ref / b_ref are this core's (K, C) f32
    partial accumulators (output blocks, resident across the reduction axis).
    """
    core = pl.program_id(0)
    step = pl.program_id(1)
    t = core * tiles_per_core + step            # global V-tile index
    start = t * v_tile

    @pl.when(step == 0)
    def _init():
        a_ref[...] = jnp.zeros_like(a_ref)
        b_ref[...] = jnp.zeros_like(b_ref)

    def _accumulate(et_ref, f_ref, out_ref, v_total):
        full = start + v_tile <= v_total
        partial = jnp.logical_and(start < v_total, jnp.logical_not(full))

        @pl.when(full)
        def _():
            out_ref[...] += jnp.dot(et_ref[...], f_ref[...],
                                    preferred_element_type=jnp.float32)

        @pl.when(partial)
        def _():
            # Tail tile: columns/rows past v_total hold unspecified bytes, so
            # select zeros on BOTH operands (never multiply: 0 * NaN = NaN).
            valid = v_total - start
            et = et_ref[...]
            f = f_ref[...]
            col = lax.broadcasted_iota(jnp.int32, et.shape, 1)
            row = lax.broadcasted_iota(jnp.int32, f.shape, 0)
            et = jnp.where(col < valid, et, jnp.zeros_like(et))
            f = jnp.where(row < valid, f, jnp.zeros_like(f))
            out_ref[...] += jnp.dot(et, f, preferred_element_type=jnp.float32)

    _accumulate(etx_ref, fx_ref, a_ref, vx)
    _accumulate(ety_ref, fy_ref, b_ref, vy)


# --------------------------------------------------------------------------- #
# Kernel 2: resolvent mask + K regularized solves (symmetric sweep)            #
# --------------------------------------------------------------------------- #
def _fm_solve_kernel(a_ref, b_ref, evx_ref, evy_ref, c_ref, *,
                     k_eig, n_split, lambda_, gamma):
    K = k_eig
    KK = K * K

    a_all = a_ref[...]                          # (n_split, K, C) f32
    b_all = b_ref[...]
    A = a_all[0]
    Bm = b_all[0]
    for s in range(1, n_split):                 # static tiny unrolled sum
        A = A + a_all[s]
        Bm = Bm + b_all[s]

    # -------- resolvent mask D (get_mask) --------
    ex = evx_ref[...]                           # (1, K)  evals_x
    ey = evy_ref[...]                           # (K, 1)  evals_y
    scale = jnp.maximum(jnp.max(ex, keepdims=True),
                        jnp.max(ey, keepdims=True))        # (1, 1)
    ex = ex / scale
    ey = ey / scale

    def _pow_gamma(v):  # v ** gamma for v >= 0 (torch pow; 0**g -> 0)
        safe = jnp.where(v > 0.0, v, 1.0)
        return jnp.where(v > 0.0, jnp.exp(gamma * jnp.log(safe)), 0.0)

    eg1 = _pow_gamma(ex)                        # (1, K)
    eg2 = _pow_gamma(ey)                        # (K, 1)
    m_re = eg2 / (eg2 * eg2 + 1.0) - eg1 / (eg1 * eg1 + 1.0)   # (K, K)
    m_im = 1.0 / (eg2 * eg2 + 1.0) - 1.0 / (eg1 * eg1 + 1.0)   # (K, K)
    D = m_re * m_re + m_im * m_im                              # D[i, j]

    # -------- lane-dense constants for the flat (K, K*K) system layout --------
    lane = lax.broadcasted_iota(jnp.int32, (1, KK), 1)
    a_idx = lane // K                            # row-within-system
    b_idx = lane % K                             # col-within-system
    rows_k = lax.broadcasted_iota(jnp.int32, (K, KK), 0)
    E_slow = (rows_k == a_idx).astype(jnp.float32)             # (K, KK)
    diag_mask = a_idx == b_idx                                 # (1, KK)
    comp_lane = lax.broadcasted_iota(jnp.int32, (1, K), 1)     # (1, K)

    # AAt directly in the flat layout: AAt_row[0, a*K+b] = sum_c A[a,c]*A[b,c]
    X = lax.dot_general(A, E_slow, (((0,), (0,)), ((), ())),
                        preferred_element_type=jnp.float32)    # (C, KK)
    Y = jnp.tile(A.T if False else A, (1, 1))                  # placeholder (unused)
    Yf = lax.dot_general(A, (rows_k == b_idx).astype(jnp.float32),
                         (((0,), (0,)), ((), ())),
                         preferred_element_type=jnp.float32)   # (C, KK) = A[b_idx, c]
    AAt_row = jnp.sum(X * Yf, axis=0, keepdims=True)           # (1, KK)

    # rhs of system i:  BAt[i, :] = Bm[i, :] @ A^T
    BAt = lax.dot_general(Bm, A, (((1,), (1,)), ((), ())),
                          preferred_element_type=jnp.float32)  # (K, K)

    # M_flat[i, a*K+b] = AAt[a, b] + lambda * D[i, a] * (a == b)
    DE = jnp.dot(D, E_slow, preferred_element_type=jnp.float32)  # (K, KK)
    M = AAt_row + lambda_ * jnp.where(diag_mask, DE, 0.0)        # (K, KK)
    v = BAt                                                      # (K, K)

    tiny = jnp.float32(1e-30)

    def sweep_step(k, carry):
        M, v = carry
        # pivot row of every system (symmetric state -> row == column)
        r = lax.dynamic_slice_in_dim(M, k * K, K, axis=1)        # (K, K)
        d = lax.dynamic_slice_in_dim(r, k, 1, axis=1)            # (K, 1)
        # sign-preserving magnitude floor for degenerate pivots
        d = jnp.where(jnp.abs(d) < tiny, jnp.where(d < 0.0, -tiny, tiny), d)
        inv_d = pl.reciprocal(d, approx=True)
        inv_d = inv_d * (2.0 - d * inv_d)                        # Newton refine
        rs = r * inv_d                                           # r / d

        # TODO(synk): replace this tiny MXU dot with an XLU/VPU lane broadcast.
        R_slow = jnp.dot(r, E_slow,
                         preferred_element_type=jnp.float32)     # (K, KK) = r[i, a_idx]
        R_fast = jnp.tile(rs, (1, K))                            # (K, KK) = rs[i, b_idx]

        row_m = a_idx == k
        col_m = b_idx == k

        # symmetric rank-1 downdate, then re-insert swept row/col/pivot
        M = M - R_slow * R_fast
        M = jnp.where(row_m, R_fast, M)                          # row k <- r/d
        M = jnp.where(col_m, R_slow * inv_d, M)                  # col k <- r/d
        M = jnp.where(row_m & col_m, -inv_d, M)                  # pivot <- -1/d

        vk = lax.dynamic_slice_in_dim(v, k, 1, axis=1) * inv_d   # (K, 1)
        v = v - r * vk
        v = jnp.where(comp_lane == k, vk, v)
        return M, v

    if K <= 32:                     # fully unrolled: K is a compile-time const
        carry = (M, v)
        for k in range(K):
            carry = sweep_step(k, carry)
    else:                           # rolled loop for large K
        carry = lax.fori_loop(0, K, sweep_step, (M, v))
    _, v = carry

    c_ref[...] = v                  # C[i, :] = solution of system i


# --------------------------------------------------------------------------- #
# Wrapper                                                                      #
# --------------------------------------------------------------------------- #
def regularized_fmnet_forward(feat_x, feat_y, evals_x, evals_y,
                              evecs_trans_x, evecs_trans_y,
                              lambda_=0.001, resolvant_gamma=0.5,
                              stream_dtype=jnp.bfloat16,
                              v_tile=None,
                              vmem_budget_bytes=12 * 1024 * 1024,
                              num_v_splits=2):
    """Pallas equivalent of RegularizedFMNet.forward.  Returns (1, K, K) f32."""
    K, Vx = evecs_trans_x.shape
    _, Vy = evecs_trans_y.shape
    Cdim = feat_x.shape[-1]

    # bf16 streaming operands (f32 accumulation happens on the MXU).
    fx = feat_x[0].astype(stream_dtype)            # (Vx, C)
    fy = feat_y[0].astype(stream_dtype)            # (Vy, C)
    etx = evecs_trans_x.astype(stream_dtype)       # (K, Vx)
    ety = evecs_trans_y.astype(stream_dtype)       # (K, Vy)
    evx = evals_x.reshape(1, K).astype(jnp.float32)
    evy = evals_y.reshape(K, 1).astype(jnp.float32)

    # ---- derive the V tile from a VMEM budget (per-generation safe) ----
    itemsize = jnp.dtype(stream_dtype).itemsize
    lane_c = _round_up(Cdim, 128)                  # feat blocks are lane-padded
    v_max = max(Vx, Vy)
    # double-buffered streamed VMEM bytes per V column (both meshes)
    bytes_per_col = 2 * 2 * (K + lane_c) * itemsize
    vt_cap = max(128, (vmem_budget_bytes // bytes_per_col) // 128 * 128)
    if v_tile is None:
        # aim for >= 2 tiles per core so the BlockSpec pipeline overlaps DMA
        v_tile = min(vt_cap, max(128, _round_up(_cdiv(v_max, 2 * num_v_splits), 128)))
    vt = _round_up(min(v_tile, vt_cap), 128)

    n_tiles_total = _cdiv(v_max, vt)
    tiles_per_core = _cdiv(n_tiles_total, num_v_splits)
    n_tiles_x = _cdiv(Vx, vt)
    n_tiles_y = _cdiv(Vy, vt)

    def _cols_map(n_tiles):
        return lambda c, v: (0, jnp.minimum(c * tiles_per_core + v, n_tiles - 1))

    def _rows_map(n_tiles):
        return lambda c, v: (jnp.minimum(c * tiles_per_core + v, n_tiles - 1), 0)

    proj_kernel = functools.partial(_projection_kernel, v_tile=vt,
                                    tiles_per_core=tiles_per_core, vx=Vx, vy=Vy)

    streamed_bytes = (Vx + Vy) * (K + Cdim) * itemsize
    cost = pl.CostEstimate(flops=2 * K * Cdim * (Vx + Vy),
                           transcendentals=0,
                           bytes_accessed=streamed_bytes)

    a_part, b_part = pl.pallas_call(
        proj_kernel,
        out_shape=(jax.ShapeDtypeStruct((num_v_splits, K, Cdim), jnp.float32),
                   jax.ShapeDtypeStruct((num_v_splits, K, Cdim), jnp.float32)),
        grid=(num_v_splits, tiles_per_core),
        in_specs=[
            pl.BlockSpec((K, vt), _cols_map(n_tiles_x)),      # evecs_trans_x tile
            pl.BlockSpec((K, vt), _cols_map(n_tiles_y)),      # evecs_trans_y tile
            pl.BlockSpec((vt, Cdim), _rows_map(n_tiles_x)),   # feat_x tile
            pl.BlockSpec((vt, Cdim), _rows_map(n_tiles_y)),   # feat_y tile
        ],
        out_specs=(
            pl.BlockSpec((None, K, Cdim), lambda c, v: (c, 0, 0)),
            pl.BlockSpec((None, K, Cdim), lambda c, v: (c, 0, 0)),
        ),
        compiler_params=pltpu.CompilerParams(
            dimension_semantics=("parallel", "arbitrary"),
            vmem_limit_bytes=32 * 1024 * 1024),
        cost_estimate=cost,
    )(etx, ety, fx, fy)

    solve_kernel = functools.partial(_fm_solve_kernel, k_eig=K,
                                     n_split=num_v_splits,
                                     lambda_=float(lambda_),
                                     gamma=float(resolvant_gamma))

    c_out = pl.pallas_call(
        solve_kernel,
        out_shape=jax.ShapeDtypeStruct((K, K), jnp.float32),
        grid=(1,),
        in_specs=[
            pl.BlockSpec((num_v_splits, K, Cdim), lambda i: (0, 0, 0)),
            pl.BlockSpec((num_v_splits, K, Cdim), lambda i: (0, 0, 0)),
            pl.BlockSpec((1, K), lambda i: (0, 0)),
            pl.BlockSpec((K, 1), lambda i: (0, 0)),
        ],
        out_specs=pl.BlockSpec((K, K), lambda i: (0, 0)),
        compiler_params=pltpu.CompilerParams(dimension_semantics=("arbitrary",)),
    )(a_part, b_part, evx, evy)

    return c_out[None, :, :]                                   # (1, K, K)


# --------------------------------------------------------------------------- #
# Pure-JAX reference (mirrors the torch module) + self-test                    #
# --------------------------------------------------------------------------- #
def reference_forward(feat_x, feat_y, evals_x, evals_y, etx, ety,
                      lambda_=0.001, gamma=0.5, stream_dtype=jnp.bfloat16):
    # projection inputs rounded to the kernel's streaming dtype so the
    # comparison isolates kernel logic rather than bf16 input rounding
    cast = lambda m: m.astype(stream_dtype).astype(jnp.float32)
    A = cast(etx) @ cast(feat_x[0])
    Bm = cast(ety) @ cast(feat_y[0])
    scale = jnp.maximum(evals_x.max(), evals_y.max())
    e1 = (evals_x / scale) ** gamma
    e2 = (evals_y / scale) ** gamma
    m_re = e2[:, None] / (e2[:, None] ** 2 + 1) - e1[None, :] / (e1[None, :] ** 2 + 1)
    m_im = 1.0 / (e2[:, None] ** 2 + 1) - 1.0 / (e1[None, :] ** 2 + 1)
    D = m_re ** 2 + m_im ** 2
    AAt = A @ A.T
    BAt = Bm @ A.T

    def solve_row(d_row, b_row):
        return jnp.linalg.solve(AAt + lambda_ * jnp.diag(d_row), b_row)

    C = jax.vmap(solve_row)(D, BAt)
    return C[None]


if __name__ == "__main__":
    # uneven mesh sizes + non-multiple-of-128 tails exercise per-mesh tile
    # counts, in-kernel tail masking, index-map clamping and the 2-way core split
    K, Vx, Vy, Cfeat = 16, 300, 200, 32
    key = jax.random.PRNGKey(0)
    k1, k2, k3, k4, k5, k6 = jax.random.split(key, 6)

    feat_x = jax.random.normal(k1, (1, Vx, Cfeat), jnp.float32)
    feat_y = jax.random.normal(k2, (1, Vy, Cfeat), jnp.float32)
    evals_x = jnp.sort(jax.random.uniform(k3, (K,), jnp.float32, 0.01, 2.0))
    evals_y = jnp.sort(jax.random.uniform(k4, (K,), jnp.float32, 0.01, 2.0))
    evecs_trans_x = 0.1 * jax.random.normal(k5, (K, Vx), jnp.float32)
    evecs_trans_y = 0.1 * jax.random.normal(k6, (K, Vy), jnp.float32)

    # small v_tile so the multi-tile reduction grid is exercised at test size
    C_out = regularized_fmnet_forward(feat_x, feat_y, evals_x, evals_y,
                                      evecs_trans_x, evecs_trans_y, v_tile=128)
    C_out = jax.block_until_ready(C_out)

    C_ref = reference_forward(feat_x, feat_y, evals_x, evals_y,
                              evecs_trans_x, evecs_trans_y)

    assert C_out.shape == (1, K, K), C_out.shape
    max_err = float(jnp.max(jnp.abs(C_out - C_ref)))
    assert max_err < 1e-2, f"mismatch vs reference: {max_err}"
    print("KERNEL_OK")
</pallas_src>

<mosaic_0001>
module attributes {stable_mosaic.version = 11 : i64} {
  func.func @_projection_kernel(%arg0: i32, %arg1: i32, %arg2: memref<16x128xbf16, #tpu.memory_space<vmem>>, %arg3: memref<16x128xbf16, #tpu.memory_space<vmem>>, %arg4: memref<128x32xbf16, #tpu.memory_space<vmem>>, %arg5: memref<128x32xbf16, #tpu.memory_space<vmem>>, %arg6: memref<1x16x32xf32, #tpu.memory_space<vmem>>, %arg7: memref<1x16x32xf32, #tpu.memory_space<vmem>>) attributes {dimension_semantics = [#tpu.dimension_semantics<parallel>, #tpu.dimension_semantics<arbitrary>], iteration_bounds = array<i64: 2, 2>, scalar_prefetch = 0 : i64, scratch_operands = 0 : i64, tpu.core_type = #tpu.core_type<tc>, window_params = [{transform_indices = @transform_0, window_bounds = array<i64: 16, 128>}, {transform_indices = @transform_1, window_bounds = array<i64: 16, 128>}, {transform_indices = @transform_2, window_bounds = array<i64: 128, 32>}, {transform_indices = @transform_3, window_bounds = array<i64: 128, 32>}, {transform_indices = @transform_4, window_bounds = array<i64: 1, 16, 32>}, {transform_indices = @transform_5, window_bounds = array<i64: 1, 16, 32>}]} {
    %c2_i32 = arith.constant 2 : i32
    %0 = arith.muli %arg0, %c2_i32 : i32
    %1 = arith.addi %0, %arg1 : i32
    %c128_i32 = arith.constant 128 : i32
    %2 = arith.muli %1, %c128_i32 : i32
    %c0_i32 = arith.constant 0 : i32
    %3 = arith.cmpi eq, %arg1, %c0_i32 : i32
    %4 = arith.extui %3 : i1 to i32
    %c0_i32_0 = arith.constant 0 : i32
    %5 = arith.cmpi ne, %4, %c0_i32_0 : i32
    scf.if %5 {
      %cst = arith.constant 0.000000e+00 : f32
      %24 = vector.broadcast %cst : f32 to vector<16x32xf32>
      %c0 = arith.constant 0 : index
      %c0_10 = arith.constant 0 : index
      %c0_11 = arith.constant 0 : index
      %25 = vector.load %arg6[%c0, %c0_10, %c0_11] : memref<1x16x32xf32, #tpu.memory_space<vmem>>, vector<1x16x32xf32>
      %26 = vector.shape_cast %25 : vector<1x16x32xf32> to vector<16x32xf32>
      %27 = vector.shape_cast %24 : vector<16x32xf32> to vector<1x16x32xf32>
      tpu.vector_store %arg6[%c0, %c0_10, %c0_11], %27 {strides = array<i32>} : memref<1x16x32xf32, #tpu.memory_space<vmem>>, vector<1x16x32xf32>,
      %cst_12 = arith.constant 0.000000e+00 : f32
      %28 = vector.broadcast %cst_12 : f32 to vector<16x32xf32>
      %c0_13 = arith.constant 0 : index
      %c0_14 = arith.constant 0 : index
      %c0_15 = arith.constant 0 : index
      %29 = vector.load %arg7[%c0_13, %c0_14, %c0_15] : memref<1x16x32xf32, #tpu.memory_space<vmem>>, vector<1x16x32xf32>
      %30 = vector.shape_cast %29 : vector<1x16x32xf32> to vector<16x32xf32>
      %31 = vector.shape_cast %28 : vector<16x32xf32> to vector<1x16x32xf32>
      tpu.vector_store %arg7[%c0_13, %c0_14, %c0_15], %31 {strides = array<i32>} : memref<1x16x32xf32, #tpu.memory_space<vmem>>, vector<1x16x32xf32>,
    } else {
    }
    %c128_i32_1 = arith.constant 128 : i32
    %6 = arith.addi %2, %c128_i32_1 : i32
    %c300_i32 = arith.constant 300 : i32
    %7 = arith.cmpi sle, %6, %c300_i32 : i32
    %c300_i32_2 = arith.constant 300 : i32
    %8 = arith.cmpi slt, %2, %c300_i32_2 : i32
    %true = arith.constant true
    %9 = arith.xori %7, %true : i1
    %10 = arith.andi %8, %9 : i1
    %11 = arith.extui %7 : i1 to i32
    %c0_i32_3 = arith.constant 0 : i32
    %12 = arith.cmpi ne, %11, %c0_i32_3 : i32
    scf.if %12 {
      %c0 = arith.constant 0 : index
      %c0_10 = arith.constant 0 : index
      %c0_11 = arith.constant 0 : index
      %24 = vector.load %arg6[%c0, %c0_10, %c0_11] : memref<1x16x32xf32, #tpu.memory_space<vmem>>, vector<1x16x32xf32>
      %25 = vector.shape_cast %24 : vector<1x16x32xf32> to vector<16x32xf32>
      %c0_12 = arith.constant 0 : index
      %c0_13 = arith.constant 0 : index
      %26 = vector.load %arg2[%c0_12, %c0_13] : memref<16x128xbf16, #tpu.memory_space<vmem>>, vector<16x128xbf16>
      %c0_14 = arith.constant 0 : index
      %c0_15 = arith.constant 0 : index
      %27 = vector.load %arg4[%c0_14, %c0_15] : memref<128x32xbf16, #tpu.memory_space<vmem>>, vector<128x32xbf16>
      %cst = arith.constant dense<0.000000e+00> : vector<16x32xf32>
      %28 = tpu.matmul %26, %27, %cst {dimension_numbers = #tpu.dot_dimension_numbers<[1], [0], [0], [1], [0, 0, 1, 1], [], []>} : vector<16x128xbf16>, vector<128x32xbf16>, vector<16x32xf32> -> vector<16x32xf32>
      %29 = arith.addf %25, %28 : vector<16x32xf32>
      %c0_16 = arith.constant 0 : index
      %c0_17 = arith.constant 0 : index
      %c0_18 = arith.constant 0 : index
      %30 = vector.load %arg6[%c0_16, %c0_17, %c0_18] : memref<1x16x32xf32, #tpu.memory_space<vmem>>, vector<1x16x32xf32>
      %31 = vector.shape_cast %30 : vector<1x16x32xf32> to vector<16x32xf32>
      %32 = vector.shape_cast %29 : vector<16x32xf32> to vector<1x16x32xf32>
      tpu.vector_store %arg6[%c0_16, %c0_17, %c0_18], %32 {strides = array<i32>} : memref<1x16x32xf32, #tpu.memory_space<vmem>>, vector<1x16x32xf32>,
    } else {
    }
    %13 = arith.extui %10 : i1 to i32
    %c0_i32_4 = arith.constant 0 : i32
    %14 = arith.cmpi ne, %13, %c0_i32_4 : i32
    scf.if %14 {
      %c300_i32_10 = arith.constant 300 : i32
      %24 = arith.subi %c300_i32_10, %2 : i32
      %c0 = arith.constant 0 : index
      %c0_11 = arith.constant 0 : index
      %25 = vector.load %arg2[%c0, %c0_11] : memref<16x128xbf16, #tpu.memory_space<vmem>>, vector<16x128xbf16>
      %c0_12 = arith.constant 0 : index
      %c0_13 = arith.constant 0 : index
      %26 = vector.load %arg4[%c0_12, %c0_13] : memref<128x32xbf16, #tpu.memory_space<vmem>>, vector<128x32xbf16>
      %27 = tpu.iota {dimensions = array<i32: 1>} : vector<16x128xi32>
      %28 = tpu.iota {dimensions = array<i32: 0>} : vector<128x32xi32>
      %29 = vector.broadcast %24 : i32 to vector<16x128xi32>
      %30 = arith.cmpi slt, %27, %29 : vector<16x128xi32>
      %cst = arith.constant 0.000000e+00 : bf16
      %31 = vector.broadcast %cst : bf16 to vector<16x128xbf16>
      %32 = arith.select %30, %25, %31 : vector<16x128xi1>, vector<16x128xbf16>
      %33 = vector.broadcast %24 : i32 to vector<128x32xi32>
      %34 = arith.cmpi slt, %28, %33 : vector<128x32xi32>
      %cst_14 = arith.constant 0.000000e+00 : bf16
      %35 = vector.broadcast %cst_14 : bf16 to vector<128x32xbf16>
      %36 = arith.select %34, %26, %35 : vector<128x32xi1>, vector<128x32xbf16>
      %c0_15 = arith.constant 0 : index
      %c0_16 = arith.constant 0 : index
      %c0_17 = arith.constant 0 : index
      %37 = vector.load %arg6[%c0_15, %c0_16, %c0_17] : memref<1x16x32xf32, #tpu.memory_space<vmem>>, vector<1x16x32xf32>
      %38 = vector.shape_cast %37 : vector<1x16x32xf32> to vector<16x32xf32>
      %cst_18 = arith.constant dense<0.000000e+00> : vector<16x32xf32>
      %39 = tpu.matmul %32, %36, %cst_18 {dimension_numbers = #tpu.dot_dimension_numbers<[1], [0], [0], [1], [0, 0, 1, 1], [], []>} : vector<16x128xbf16>, vector<128x32xbf16>, vector<16x32xf32> -> vector<16x32xf32>
      %40 = arith.addf %38, %39 : vector<16x32xf32>
      %c0_19 = arith.constant 0 : index
      %c0_20 = arith.constant 0 : index
      %c0_21 = arith.constant 0 : index
      %41 = vector.load %arg6[%c0_19, %c0_20, %c0_21] : memref<1x16x32xf32, #tpu.memory_space<vmem>>, vector<1x16x32xf32>
      %42 = vector.shape_cast %41 : vector<1x16x32xf32> to vector<16x32xf32>
      %43 = vector.shape_cast %40 : vector<16x32xf32> to vector<1x16x32xf32>
      tpu.vector_store %arg6[%c0_19, %c0_20, %c0_21], %43 {strides = array<i32>} : memref<1x16x32xf32, #tpu.memory_space<vmem>>, vector<1x16x32xf32>,
    } else {
    }
    %c128_i32_5 = arith.constant 128 : i32
    %15 = arith.addi %2, %c128_i32_5 : i32
    %c200_i32 = arith.constant 200 : i32
    %16 = arith.cmpi sle, %15, %c200_i32 : i32
    %c200_i32_6 = arith.constant 200 : i32
    %17 = arith.cmpi slt, %2, %c200_i32_6 : i32
    %true_7 = arith.constant true
    %18 = arith.xori %16, %true_7 : i1
    %19 = arith.andi %17, %18 : i1
    %20 = arith.extui %16 : i1 to i32
    %c0_i32_8 = arith.constant 0 : i32
    %21 = arith.cmpi ne, %20, %c0_i32_8 : i32
    scf.if %21 {
      %c0 = arith.constant 0 : index
      %c0_10 = arith.constant 0 : index
      %c0_11 = arith.constant 0 : index
      %24 = vector.load %arg7[%c0, %c0_10, %c0_11] : memref<1x16x32xf32, #tpu.memory_space<vmem>>, vector<1x16x32xf32>
      %25 = vector.shape_cast %24 : vector<1x16x32xf32> to vector<16x32xf32>
      %c0_12 = arith.constant 0 : index
      %c0_13 = arith.constant 0 : index
      %26 = vector.load %arg3[%c0_12, %c0_13] : memref<16x128xbf16, #tpu.memory_space<vmem>>, vector<16x128xbf16>
      %c0_14 = arith.constant 0 : index
      %c0_15 = arith.constant 0 : index
      %27 = vector.load %arg5[%c0_14, %c0_15] : memref<128x32xbf16, #tpu.memory_space<vmem>>, vector<128x32xbf16>
      %cst = arith.constant dense<0.000000e+00> : vector<16x32xf32>
      %28 = tpu.matmul %26, %27, %cst {dimension_numbers = #tpu.dot_dimension_numbers<[1], [0], [0], [1], [0, 0, 1, 1], [], []>} : vector<16x128xbf16>, vector<128x32xbf16>, vector<16x32xf32> -> vector<16x32xf32>
      %29 = arith.addf %25, %28 : vector<16x32xf32>
      %c0_16 = arith.constant 0 : index
      %c0_17 = arith.constant 0 : index
      %c0_18 = arith.constant 0 : index
      %30 = vector.load %arg7[%c0_16, %c0_17, %c0_18] : memref<1x16x32xf32, #tpu.memory_space<vmem>>, vector<1x16x32xf32>
      %31 = vector.shape_cast %30 : vector<1x16x32xf32> to vector<16x32xf32>
      %32 = vector.shape_cast %29 : vector<16x32xf32> to vector<1x16x32xf32>
      tpu.vector_store %arg7[%c0_16, %c0_17, %c0_18], %32 {strides = array<i32>} : memref<1x16x32xf32, #tpu.memory_space<vmem>>, vector<1x16x32xf32>,
    } else {
    }
    %22 = arith.extui %19 : i1 to i32
    %c0_i32_9 = arith.constant 0 : i32
    %23 = arith.cmpi ne, %22, %c0_i32_9 : i32
    scf.if %23 {
      %c200_i32_10 = arith.constant 200 : i32
      %24 = arith.subi %c200_i32_10, %2 : i32
      %c0 = arith.constant 0 : index
      %c0_11 = arith.constant 0 : index
      %25 = vector.load %arg3[%c0, %c0_11] : memref<16x128xbf16, #tpu.memory_space<vmem>>, vector<16x128xbf16>
      %c0_12 = arith.constant 0 : index
      %c0_13 = arith.constant 0 : index
      %26 = vector.load %arg5[%c0_12, %c0_13] : memref<128x32xbf16, #tpu.memory_space<vmem>>, vector<128x32xbf16>
      %27 = tpu.iota {dimensions = array<i32: 1>} : vector<16x128xi32>
      %28 = tpu.iota {dimensions = array<i32: 0>} : vector<128x32xi32>
      %29 = vector.broadcast %24 : i32 to vector<16x128xi32>
      %30 = arith.cmpi slt, %27, %29 : vector<16x128xi32>
      %cst = arith.constant 0.000000e+00 : bf16
      %31 = vector.broadcast %cst : bf16 to vector<16x128xbf16>
      %32 = arith.select %30, %25, %31 : vector<16x128xi1>, vector<16x128xbf16>
      %33 = vector.broadcast %24 : i32 to vector<128x32xi32>
      %34 = arith.cmpi slt, %28, %33 : vector<128x32xi32>
      %cst_14 = arith.constant 0.000000e+00 : bf16
      %35 = vector.broadcast %cst_14 : bf16 to vector<128x32xbf16>
      %36 = arith.select %34, %26, %35 : vector<128x32xi1>, vector<128x32xbf16>
      %c0_15 = arith.constant 0 : index
      %c0_16 = arith.constant 0 : index
      %c0_17 = arith.constant 0 : index
      %37 = vector.load %arg7[%c0_15, %c0_16, %c0_17] : memref<1x16x32xf32, #tpu.memory_space<vmem>>, vector<1x16x32xf32>
      %38 = vector.shape_cast %37 : vector<1x16x32xf32> to vector<16x32xf32>
      %cst_18 = arith.constant dense<0.000000e+00> : vector<16x32xf32>
      %39 = tpu.matmul %32, %36, %cst_18 {dimension_numbers = #tpu.dot_dimension_numbers<[1], [0], [0], [1], [0, 0, 1, 1], [], []>} : vector<16x128xbf16>, vector<128x32xbf16>, vector<16x32xf32> -> vector<16x32xf32>
      %40 = arith.addf %38, %39 : vector<16x32xf32>
      %c0_19 = arith.constant 0 : index
      %c0_20 = arith.constant 0 : index
      %c0_21 = arith.constant 0 : index
      %41 = vector.load %arg7[%c0_19, %c0_20, %c0_21] : memref<1x16x32xf32, #tpu.memory_space<vmem>>, vector<1x16x32xf32>
      %42 = vector.shape_cast %41 : vector<1x16x32xf32> to vector<16x32xf32>
      %43 = vector.shape_cast %40 : vector<16x32xf32> to vector<1x16x32xf32>
      tpu.vector_store %arg7[%c0_19, %c0_20, %c0_21], %43 {strides = array<i32>} : memref<1x16x32xf32, #tpu.memory_space<vmem>>, vector<1x16x32xf32>,
    } else {
    }
    return
  }
  func.func @transform_0(%arg0: i32, %arg1: i32) -> (i32, i32) {
    %c2_i32 = arith.constant 2 : i32
    %0 = arith.muli %arg0, %c2_i32 : i32
    %1 = arith.addi %0, %arg1 : i32
    %c2_i32_0 = arith.constant 2 : i32
    %2 = arith.minsi %1, %c2_i32_0 : i32
    %c0_i32 = arith.constant 0 : i32
    %c0_i32_1 = arith.constant 0 : i32
    return %c0_i32, %2 : i32, i32
  }
  func.func @transform_1(%arg0: i32, %arg1: i32) -> (i32, i32) {
    %c2_i32 = arith.constant 2 : i32
    %0 = arith.muli %arg0, %c2_i32 : i32
    %1 = arith.addi %0, %arg1 : i32
    %c1_i32 = arith.constant 1 : i32
    %2 = arith.minsi %1, %c1_i32 : i32
    %c0_i32 = arith.constant 0 : i32
    %c0_i32_0 = arith.constant 0 : i32
    return %c0_i32, %2 : i32, i32
  }
  func.func @transform_2(%arg0: i32, %arg1: i32) -> (i32, i32) {
    %c2_i32 = arith.constant 2 : i32
    %0 = arith.muli %arg0, %c2_i32 : i32
    %1 = arith.addi %0, %arg1 : i32
    %c2_i32_0 = arith.constant 2 : i32
    %2 = arith.minsi %1, %c2_i32_0 : i32
    %c0_i32 = arith.constant 0 : i32
    %c0_i32_1 = arith.constant 0 : i32
    return %2, %c0_i32 : i32, i32
  }
  func.func @transform_3(%arg0: i32, %arg1: i32) -> (i32, i32) {
    %c2_i32 = arith.constant 2 : i32
    %0 = arith.muli %arg0, %c2_i32 : i32
    %1 = arith.addi %0, %arg1 : i32
    %c1_i32 = arith.constant 1 : i32
    %2 = arith.minsi %1, %c1_i32 : i32
    %c0_i32 = arith.constant 0 : i32
    %c0_i32_0 = arith.constant 0 : i32
    return %2, %c0_i32 : i32, i32
  }
  func.func @transform_4(%arg0: i32, %arg1: i32) -> (i32, i32, i32) {
    %c0_i32 = arith.constant 0 : i32
    %c0_i32_0 = arith.constant 0 : i32
    %c0_i32_1 = arith.constant 0 : i32
    return %arg0, %c0_i32, %c0_i32_0 : i32, i32, i32
  }
  func.func @transform_5(%arg0: i32, %arg1: i32) -> (i32, i32, i32) {
    %c0_i32 = arith.constant 0 : i32
    %c0_i32_0 = arith.constant 0 : i32
    %c0_i32_1 = arith.constant 0 : i32
    return %arg0, %c0_i32, %c0_i32_0 : i32, i32, i32
  }
}

</mosaic_0001>

<bundles_post_ra>
// kernel: tpu_custom_call.1
= control target key start
LH: loop header
LB: loop body
LE: loop exit
PB: predicated region body
PF: predicated region fallthrough
CT: control target
= control target key end

     0   :  { %s2232_s0 = inlined_call_operand.vmem [shape: bf16[16,300], index: 0, kind: input, shape index: {}]   ;;  %s2233_s1 = inlined_call_operand.vmem [shape: bf16[16,200], index: 1, kind: input, shape index: {}]   ;;  %s2234_s2 = inlined_call_operand.vmem [shape: bf16[300,32], index: 2, kind: input, shape index: {}]   ;;  %s2235_s3 = inlined_call_operand.vmem [shape: bf16[200,32], index: 3, kind: input, shape index: {}]   ;;  %s2236_s4 = inlined_call_operand.hbm [shape: f32[2,16,32], index: 4, kind: output, shape index: {0}]   ;;  %s2237_s5 = inlined_call_operand.hbm [shape: f32[2,16,32], index: 5, kind: output, shape index: {1}]  }
   0x1   :  { %2245 = sst [smem:[#allocation17_spill]] %s2232_s0 }
   0x2   :  { %2246 = sst [smem:[#allocation18_spill]] %s2233_s1 }
   0x3   :  { %2247 = sst [smem:[#allocation19_spill]] %s2235_s3 }
   0x4   :  { %2248 = sst [smem:[#allocation20_spill]] %s2236_s4 }
   0x5   :  { %2249 = sst [smem:[#allocation21_spill]] %s2237_s5 }
   0x6   :  { %11 = vsyncpa [#allocation5], 0 }
   0x7   :  { %13 = vsyncpa [#allocation5 + $0x1], 0 }
   0x8   :  { %14 = vsyncpa [#allocation7], 0 }
   0x9   :  { %16 = vsyncpa [#allocation7 + $0x1], 0  ;;  %s1714_s18 = smov 0   ;;  %s1716_s19 = smov 0  }
   0xa   :  { %s1718_s20 = smov 0   ;;  %s1720_s21 = smov 0  }
   0xb   :  { %s1722_s22 = smov 0   ;;  %s1724_s23 = smov 0  }
   0xc   :  { %s1726_s24 = smov 0   ;;  %s1728_s25 = smov 0  }
   0xd   :  { %s1730_s26 = smov 0   ;;  %s1732_s27 = smov 0  }
   0xe   :  { %s1734_s28 = smov 0   ;;  %s1736_s29 = smov 0  }
   0xf LB: > { %2250 = sst [smem:[#allocation10_spill]] %s1659_s24  ;;  %s31_s7 = sadd.s32 1, %s1671_s27  ;;  %s1679_s29 = sphi %s1736_s29, %s22_s29   ;;  %s1675_s28 = sphi %s1734_s28, %s2308_s28   ;;  %s1671_s27 = sphi %s1732_s27, %s2307_s27   ;;  %s1667_s26 = sphi %s1730_s26, %s2306_s26   ;;  %s1663_s25 = sphi %s1728_s25, %s2305_s25   ;;  %s1659_s24 = sphi %s1726_s24, %s2304_s24   ;;  %s1655_s23 = sphi %s1724_s23, %s2303_s23   ;;  %s1651_s22 = sphi %s1722_s22, %s2313_s22   ;;  %s1647_s21 = sphi %s1720_s21, %s2312_s21   ;;  %s1643_s20 = sphi %s1718_s20, %s2311_s20   ;;  %s1639_s19 = sphi %s1716_s19, %s2310_s19   ;;  %s1635_s18 = sphi %s1714_s18, %s2309_s18  }
  0x10   : > { %2251 = sst [smem:[#allocation11_spill]] %s1671_s27  ;;  %s34_s8 = sadd.s32 1, %s1675_s28 }
  0x11   : > { %2252 = sst [smem:[#allocation12_spill]] %s1675_s28  ;;  %p32_p0 = scmp.ge.s32.totalorder %s31_s7, 2 }
  0x12   : > { %s1278_s9 = sshll.u32 %s1675_s28, 1  ;;  %s49_s11 = sadd.s32 1, %s1659_s24 }
  0x13   : > { %s39_s10 = sadd.s32 %s1671_s27, %s1278_s9  ;;  %s2315_s7 = smov (%p32_p0, %s31_s7), 0 }
  0x14   : > { %2253 = sst [smem:[#allocation13_spill]] %s2315_s7  ;;  %s2317_s8 = smov (!%p32_p0, %s34_s8), %s1675_s28 }
  0x15   : > { %p40_p1 = scmp.lt.s32.totalorder %s39_s10, 2  ;;  %p56_p2 = scmp.ne.s32.totalorder %s1659_s24, %s1655_s23 }
  0x16   : > { %p36_p3 = scmp.ge.s32.totalorder %s2317_s8, 2  ;;  %p57_p4 = scmp.eq.s32.totalorder %s1679_s29, 0 }
  0x17   : > { %s1787_s12 = scalar_select %p40_p1, %s39_s10, 2 }
  0x18   : > { %s2319_s8 = smov (%p36_p3, %s2317_s8), 0  ;;  %p1793_p5 = por %p57_p4, %p56_p2 }
  0x19   : > { %2254 = sst [smem:[#allocation14_spill]] %s2319_s8  ;;  %p74_p6 = scmp.lt.s32.totalorder %s39_s10, 1 }
  0x1a   : > { %s1279_s14 = sshll.u32 %s2319_s8, 1  ;;  %s83_s15 = sadd.s32 1, %s1651_s22 }
  0x1b   : > { %s43_s16 = sadd.s32 %s1279_s14, %s2315_s7  ;;  %p90_p7 = scmp.ne.s32.totalorder %s1651_s22, %s1647_s21 }
  0x1c   : > { %p44_p8 = scmp.lt.s32.totalorder %s43_s16, 2  ;;  %p78_p9 = scmp.lt.s32.totalorder %s43_s16, 1 }
  0x1d   : > { %s2321_s10 = smov (!%p74_p6, %s39_s10), 1  ;;  %p1807_p10 = por %p90_p7, %p57_p4 }
  0x1e   : > { %s45_s17 = scalar_select %p44_p8, %s43_s16, 2 }
  0x1f   : > { %s2323_s16 = smov (!%p78_p9, %s43_s16), 1  ;;  %s174_s30 = ssub.s32 %s1675_s28, %s2319_s8 }
  0x20   : > { %s46_s9 = ssub.s32 %s1787_s12, %s45_s17  ;;  %s80_s6 = ssub.s32 %s2321_s10, %s2323_s16 }
  0x21   : > { %p47_p11 = scmp.eq.s32.totalorder %s46_s9, 0  ;;  %p81_p12 = scmp.eq.s32.totalorder %s80_s6, 0 }
  0x22   : > { %p175_p13 = scmp.eq.s32.totalorder %s174_s30, 0  ;;  %s177_s5 = sadd.s32 1, %s1643_s20 }
  0x23   : > { %s1815_s7 = scalar_select %p47_p11, %s1659_s24, %s49_s11  }
  0x24   : > { %s1818_s27 = scalar_select %p81_p12, %s1651_s22, %s83_s15  }
  0x25   : > { %2257 = sst [smem:[#allocation15_spill]] %s1815_s7  ;;  %p187_p0 = scmp.ne.s32.totalorder %s1643_s20, %s1639_s19 }
  0x26   : > { %2258 = sst [smem:[#allocation16_spill]] %s1818_s27  ;;  %s2259_s4 = sadd.s32 4294967295, %s1679_s29  }
  0x27   : > { %p188_p1 = scmp.eq.s32.totalorder %s2259_s4, 3  ;;  %p193_p3 = scmp.ne.s32.totalorder %s1639_s19, %s1635_s18 }
  0x28   : > { %s1826_s3 = scalar_select %p175_p13, %s1643_s20, %s177_s5  }
  0x29   : > { %p1828_p2 = por %p188_p1, %p187_p0  ;;  %s2261_s9 = sadd.s32 4294967294, %s1679_s29  }
  0x2a   : > { %p194_p4 = scmp.eq.s32.totalorder %s2261_s9, 3  ;;  %p1287_p7 = scmp.ge.s32.totalorder %s1679_s29, 4 }
  0x2c   : > { %p1836_p6 = por %p194_p4, %p193_p3  ;;  %236 = sbr.rel (%p1287_p7) target bundleno = 73 (0x49), region = 16 }
  0x31   : > { %239 = sbr.rel (!%p1793_p5) target bundleno = 61 (0x3d), region = 20  ;;  %s241_s4 = sand.u32 (%p1793_p5), 1, %s1659_s24  }
  0x32   : > { %s1290_s5 = sshll.u32 (%p1793_p5), %s1787_s12, 2  ;;  %s1288_s30 = sshll.u32 (%p1793_p5), %s241_s4, 3 }
  0x33   : > { %s2263_s0 = sld [smem:[#allocation17_spill]] (%p1793_p5)  ;;  %s243_s9 = scalar_lea.vmem (%p1793_p5), [#allocation2], %s1288_s30 }
  0x39   : > { %s249_s16 = scalar_lea.vmem %s2263_s0, %s1290_s5 }
  0x3a   : > { %v266_v0 = vld [vmem:[%s249_s16] sm:$0xf]  ;;  %v268_v1 = vld [vmem:[%s249_s16 + $0xc] sm:$0xf] }
  0x3b   : > { %267 = vst [vmem:[%s243_s9] sm:$0xf] %v266_v0 }
  0x3c   : > { %269 = vst [vmem:[%s243_s9 + $0x4] sm:$0xf] %v268_v1 }
  0x3d PF: > { %297 = sbr.rel (!%p1807_p10) target bundleno = 73 (0x49), region = 61  ;;  %s299_s13 = sand.u32 (%p1807_p10), 1, %s1651_s22  }
  0x3e   : > { %s1293_s8 = sshll.u32 (%p1807_p10), %s2321_s10, 2  ;;  %s1291_s28 = sshll.u32 (%p1807_p10), %s299_s13, 3 }
  0x3f   : > { %s2264_s1 = sld [smem:[#allocation18_spill]] (%p1807_p10)  ;;  %s301_s5 = scalar_lea.vmem (%p1807_p10), [#allocation3], %s1291_s28 }
  0x45   : > { %s307_s7 = scalar_lea.vmem %s2264_s1, %s1293_s8 }
  0x46   : > { %v324_v2 = vld [vmem:[%s307_s7] sm:$0xf]  ;;  %v326_v3 = vld [vmem:[%s307_s7 + $0x8] sm:$0xf] }
  0x47   : > { %325 = vst [vmem:[%s301_s5] sm:$0xf] %v324_v2 }
  0x48   : > { %327 = vst [vmem:[%s301_s5 + $0x4] sm:$0xf] %v326_v3 }
  0x49 PF: > { %p1294_p5 = scmp.ge.s32.totalorder %s1679_s29, 1  ;;  %p404_p8 = scmp.lt.s32.totalorder %s1679_s29, 5 }
  0x4b   : > { %p405_p9 = pnand %p1294_p5, %p404_p8 }
  0x4c   : > { %s411_s10 = sand.u32 (!%p405_p9), 1, %s1655_s23   ;;  %s418_s8 = sand.u32 (!%p405_p9), 1, %s1647_s21  }
  0x4d   : > { %408 = sbr.rel (%p405_p9) target bundleno = 871 (0x367), region = 110  ;;  %s1295_s14 = sshll.u32 (!%p405_p9), %s411_s10, 3 }
  0x4e   : > { %s1296_s7 = sshll.u32 (!%p405_p9), %s418_s8, 3  ;;  %s1860_s28 = sand.u32 (!%p405_p9), 1, %s1639_s19  }
  0x4f   : > { %s1299_s30 = sshll.u32 (!%p405_p9), %s1667_s26, 1  ;;  %s1297_s11 = sshll.u32 (!%p405_p9), %s1860_s28, 4 }
  0x50   : > { %s489_s15 = sadd.s32 (!%p405_p9), %s1663_s25, %s1299_s30  ;;  %s2265_s0 = sld [smem:[#allocation19_spill]] (!%p405_p9) }
  0x51   : > { %p490_p10 = scmp.lt.s32.totalorder (!%p405_p9), %s489_s15, 2  ;;  %p512_p11 = scmp.lt.s32.totalorder (!%p405_p9), %s489_s15, 1 }
  0x52   : > { %s1865_s16 = sshll.u32 %s489_s15, 7  ;;  %s1877_s24 = scalar_lea.vmem [#allocation2], %s1295_s14 }
  0x53   : > { %s491_s9 = scalar_select %p490_p10, %s489_s15, 2 }
  0x54   : > { %s2325_s15 = smov (!%p512_p11, %s489_s15), 1  ;;  %s1883_s27 = scalar_lea.vmem [#allocation6], %s1297_s11 }
  0x55   : > { %s1300_s13 = sshll.u32 %s491_s9, 4  ;;  %s1303_s12 = sshll.u32 %s2325_s15, 4 }
  0x56   : > { %p497_p12 = scmp.lt.s32.totalorder %s1300_s13, 37  ;;  %p519_p13 = scmp.lt.s32.totalorder %s1303_s12, 24 }
  0x57   : > { %s1879_s9 = scalar_lea.vmem [#allocation3], %s1296_s7  ;;  %s1881_s15 = scalar_lea.vmem [#allocation4], %s1297_s11 }
  0x58   : > { %s2327_s13 = smov (!%p497_p12, %s1300_s13), 37  ;;  %s2329_s12 = smov (!%p519_p13, %s1303_s12), 24 }
  0x59   : > { %s1301_s21 = sshll.u32 %s2327_s13, 2  ;;  %s1304_s10 = sshll.u32 %s2329_s12, 2 }
  0x5a   : > { %s1870_s5 = scalar_lea.vmem %s2234_s2, %s1301_s21  ;;  %s1875_s1 = scalar_lea.vmem %s2265_s0, %s1304_s10 }
  0x5b   : > { %p1307_p0 = scmp.ne.s32.totalorder %s1663_s25, 0 }
  0x5d   : > { %539 = sbr.rel (%p1307_p0) target bundleno = 103 (0x67), region = 122 }
  0x62   : > { %vm540_vm0 = vcmask 261120   ;;  %v1681_v4 = vmov 0.0  }
  0x63   : > { %541 = vst.msk [vmem:[%s1881_s15] sm:$0xff] %vm540_vm0, %v1681_v4 }
  0x64   : > { %542 = vst.msk [vmem:[%s1881_s15 + $0x8] sm:$0xff] %vm540_vm0, %v1681_v4 }
  0x65   : > { %543 = vst.msk [vmem:[%s1883_s27] sm:$0xff] %vm540_vm0, %v1681_v4 }
  0x66   : > { %544 = vst.msk [vmem:[%s1883_s27 + $0x8] sm:$0xff] %vm540_vm0, %v1681_v4 }
  0x67 PF: > { %s545_s0 = sadd.s32 128, %s1865_s16  ;;  %p547_p1 = scmp.lt.s32.totalorder %s1865_s16, 300 }
  0x68   : > { %p548_p3 = scmp.gt.s32.totalorder %s545_s0, 300 }
  0x6a   : > { %p1894_p4 = pnand %p548_p3, %p547_p1  ;;  %553 = sbr.rel (%p548_p3) target bundleno = 280 (0x118), region = 126 }
  0x6f   : > { %v1398_v5 = vld [vmem:[%s1870_s5 + $0x38] sm:$0xff]  ;;  %v1397_v6 = vld [vmem:[%s1870_s5 + $0x30] sm:$0xff]  ;;  %v1396_v7 = vld [vmem:[%s1870_s5 + $0x28] sm:$0xff]  ;;  %vm644_vm1 = vcmask 261120  }
  0x70   : > { %628 = vmatpush.bf16.msra.mxu0 %v1398_v5  ;;  %v1395_v8 = vld [vmem:[%s1870_s5 + $0x20] sm:$0xff]  ;;  %v1394_v9 = vld [vmem:[%s1870_s5 + $0x18] sm:$0xff]  ;;  %v1393_v10 = vld [vmem:[%s1870_s5 + $0x10] sm:$0xff] }
  0x71   : > { %v1392_v11 = vld [vmem:[%s1870_s5 + $0x8] sm:$0xff]  ;;  %v1391_v12 = vld [vmem:[%s1870_s5] sm:$0xff] }
  0x72   : > { %v1390_v13 = vld [vmem:[%s1877_s24] sm:$0xff]  ;;  %v555_v17 = vld [vmem:[%s1881_s15 + $0x8] sm:$0xff] }
  0x73   : > { %v554_v14 = vld [vmem:[%s1881_s15] sm:$0xff] }
  0x74   : > { %629 = vmatpush.bf16.msra.mxu0 %v1397_v6 }
  0x78   : > { %630 = vmatpush.bf16.msra.mxu0 %v1396_v7 }
  0x7c   : > { %631 = vmatpush.bf16.msra.mxu0 %v1395_v8 }
  0x80   : > { %632 = vmatpush.bf16.msra.mxu0 %v1394_v9 }
  0x84   : > { %633 = vmatpush.bf16.msra.mxu0 %v1393_v10 }
  0x88   : > { %634 = vmatpush.bf16.msra.mxu0 %v1392_v11 }
  0x8c   : > { %635 = vmatpush.bf16.msra.mxu0 %v1391_v12 }
  0x8f   : > { %636 = vmatmul.bf16.vlgmr.msra.gmra.mxu0 %v1390_v13 }
 0x10c   : > { %v637_v15 = vpop.f32.mrf.mxu0 }
 0x10d   : > { %v642_v16 = vadd.f32 %v637_v15, %v554_v14 }
 0x10f   : > { %645 = vst.msk [vmem:[%s1881_s15] sm:$0xff] %vm644_vm1, %v642_v16 }
 0x114   : > { %v639_v18 = vpop.f32.mrf.mxu0 }
 0x115   : > { %v643_v19 = vadd.f32 %v639_v18, %v555_v17 }
 0x117   : > { %646 = vst.msk [vmem:[%s1881_s15 + $0x8] sm:$0xff] %vm644_vm1, %v643_v19 }
 0x118 PF: > { %648 = sbr.rel (%p1894_p4) target bundleno = 467 (0x1d3), region = 130  ;;  %s649_s14 = ssub.s32 (!%p1894_p4), 300, %s1865_s16 }
 0x11d   : > { %v668_v20 = vlaneseq  ;;  %v1917_v22 = vstv %s649_s14  ;;  %v666_v27 = vld [vmem:[%s1870_s5 + $0x38] sm:$0xf]  ;;  %v667_v30 = vld [vmem:[%s1870_s5 + $0x3c] sm:$0xf]  ;;  %v664_v32 = vld [vmem:[%s1870_s5 + $0x30] sm:$0xf] }
 0x11e   : > { %v665_v35 = vld [vmem:[%s1870_s5 + $0x34] sm:$0xf]  ;;  %v662_v39 = vld [vmem:[%s1870_s5 + $0x28] sm:$0xf]  ;;  %v663_v43 = vld [vmem:[%s1870_s5 + $0x2c] sm:$0xf] }
 0x11f   : > { %v1915_v21 = vshrl.u32 %v668_v20, 7  ;;  %v660_v51 = vld [vmem:[%s1870_s5 + $0x20] sm:$0xf]  ;;  %v661_v52 = vld [vmem:[%s1870_s5 + $0x24] sm:$0xf] }
 0x120   : > { %v658_v62 = vld [vmem:[%s1870_s5 + $0x18] sm:$0xf]  ;;  %v659_v63 = vld [vmem:[%s1870_s5 + $0x1c] sm:$0xf]  ;;  %v656_v9 = vld [vmem:[%s1870_s5 + $0x10] sm:$0xf] }
 0x121   : > { %v685_v23 = vadd.s32 112, %v1915_v21  ;;  %v686_v24 = vadd.s32 120, %v1915_v21  ;;  %v683_v25 = vadd.s32 96, %v1915_v21  ;;  %v684_v26 = vadd.s32 104, %v1915_v21  ;;  %v657_v10 = vld [vmem:[%s1870_s5 + $0x14] sm:$0xf] }
 0x122   : > { %v681_v28 = vadd.s32 80, %v1915_v21  ;;  %v682_v29 = vadd.s32 88, %v1915_v21  ;;  %v679_v31 = vadd.s32 64, %v1915_v21  ;;  %v680_v33 = vadd.s32 72, %v1915_v21  ;;  %v654_v19 = vld [vmem:[%s1870_s5 + $0x8] sm:$0xf] }
 0x123   : > { %vm706_vm2 = vcmp.lt.s32.totalorder %v685_v23, %v1917_v22  ;;  %vm707_vm3 = vcmp.lt.s32.totalorder %v686_v24, %v1917_v22  ;;  %vm704_vm4 = vcmp.lt.s32.totalorder %v683_v25, %v1917_v22  ;;  %vm705_vm6 = vcmp.lt.s32.totalorder %v684_v26, %v1917_v22  ;;  %v655_v23 = vld [vmem:[%s1870_s5 + $0xc] sm:$0xf]  ;;  %v740_v46 = vld [vmem:[%s1881_s15] sm:$0xff] }
 0x124   : > { %vm722_vm5 = vmpackc.low %vm706_vm2, %vm706_vm2  ;;  %vm702_vm8 = vcmp.lt.s32.totalorder %v681_v28, %v1917_v22  ;;  %v677_v36 = vadd.s32 48, %v1915_v21  ;;  %vm703_vm10 = vcmp.lt.s32.totalorder %v682_v29, %v1917_v22  ;;  %v678_v40 = vadd.s32 56, %v1915_v21 }
 0x125   : > { %vm723_vm7 = vmpackc.low %vm707_vm3, %vm707_vm3  ;;  %v738_v34 = vsel %vm722_vm5, %v666_v27, 0  ;;  %vm700_vm12 = vcmp.lt.s32.totalorder %v679_v31, %v1917_v22  ;;  %vm701_vm14 = vcmp.lt.s32.totalorder %v680_v33, %v1917_v22  ;;  %v675_v47 = vadd.s32 32, %v1915_v21  ;;  %v652_v31 = vld [vmem:[%s1870_s5] sm:$0xf] }
 0x126   : > { %v739_v37 = vsel %vm723_vm7, %v667_v30, 0  ;;  %v778_v38 = vunpack.c.l.b16 %v738_v34  ;;  %vm720_vm9 = vmpackc.low %vm704_vm4, %vm704_vm4  ;;  %vm698_vm0 = vcmp.lt.s32.totalorder %v677_v36, %v1917_v22  ;;  %vm699_vm2 = vcmp.lt.s32.totalorder %v678_v40, %v1917_v22  ;;  %v650_v36 = vld [vmem:[%s1877_s24] sm:$0xf] }
 0x127   : > { %v779_v41 = vunpack.c.l.b16 %v739_v37  ;;  %vm721_vm11 = vmpackc.low %vm705_vm6, %vm705_vm6  ;;  %v736_v42 = vsel %vm720_vm9, %v664_v32, 0  ;;  %v676_v55 = vadd.s32 40, %v1915_v21  ;;  %vm696_vm6 = vcmp.lt.s32.totalorder %v675_v47, %v1917_v22  ;;  %v653_v32 = vld [vmem:[%s1870_s5 + $0x4] sm:$0xf] }
 0x128   : > { %v737_v44 = vsel %vm721_vm11, %v665_v35, 0  ;;  %v776_v45 = vunpack.c.l.b16 %v736_v42  ;;  %vm1942_vm13 = vmpackc.low %vm702_vm8, %vm702_vm8  ;;  %v673_v1 = vadd.s32 16, %v1915_v21  ;;  %v674_v2 = vadd.s32 24, %v1915_v21  ;;  %v651_v37 = vld [vmem:[%s1877_s24 + $0x4] sm:$0xf] }
 0x129   : > { %v787_v48 = vpack.c.b16 %v779_v41, %v778_v38  ;;  %v777_v49 = vunpack.c.l.b16 %v737_v44  ;;  %vm719_vm15 = vmpackc.low %vm703_vm10, %vm703_vm10  ;;  %v734_v50 = vsel %vm1942_vm13, %v662_v39, 0  ;;  %vm697_vm7 = vcmp.lt.s32.totalorder %v676_v55, %v1917_v22 }
 0x12a   : > { %v735_v53 = vsel %vm719_vm15, %v663_v43, 0  ;;  %vm1953_vm1 = vmpackc.low %vm700_vm12, %vm700_vm12  ;;  %v774_v57 = vunpack.c.l.b16 %v734_v50  ;;  %vm694_vm10 = vcmp.lt.s32.totalorder %v673_v1, %v1917_v22  ;;  %vm695_vm11 = vcmp.lt.s32.totalorder %v674_v2, %v1917_v22 }
 0x12b   : > { %796 = vmatpush.bf16.msra.mxu0 %v787_v48  ;;  %v786_v56 = vpack.c.b16 %v777_v49, %v776_v45  ;;  %v775_v58 = vunpack.c.l.b16 %v735_v53  ;;  %vm717_vm3 = vmpackc.low %vm701_vm14, %vm701_vm14  ;;  %v732_v59 = vsel %vm1953_vm1, %v660_v51, 0  ;;  %v672_v12 = vadd.s32 8, %v1915_v21  ;;  %v741_v49 = vld [vmem:[%s1881_s15 + $0x8] sm:$0xff] }
 0x12c   : > { %v733_v60 = vsel %vm717_vm3, %v661_v52, 0  ;;  %vm1964_vm4 = vmpackc.low %vm698_vm0, %vm698_vm0  ;;  %v772_v4 = vunpack.c.l.b16 %v732_v59  ;;  %vm692_vm14 = vcmp.lt.s32.totalorder %v1915_v21, %v1917_v22  ;;  %v669_v25 = vand.u32 127, %v668_v20 }
 0x12d   : > { %vm1970_vm5 = vmpackc.low %vm699_vm2, %vm699_vm2  ;;  %v785_v3 = vpack.c.b16 %v775_v58, %v774_v57  ;;  %v773_v5 = vunpack.c.l.b16 %v733_v60  ;;  %v730_v6 = vsel %vm1964_vm4, %v658_v62, 0  ;;  %vm693_vm15 = vcmp.lt.s32.totalorder %v672_v12, %v1917_v22 }
 0x12e   : > { %v731_v7 = vsel %vm1970_vm5, %v659_v63, 0  ;;  %vm1982_vm8 = vmpackc.low %vm696_vm6, %vm696_vm6  ;;  %v770_v14 = vunpack.c.l.b16 %v730_v6  ;;  %vm688_vm2 = vcmp.lt.s32.totalorder %v669_v25, %v1917_v22  ;;  %vm812_vm4 = vcmask 261120  }
 0x12f   : > { %797 = vmatpush.bf16.msra.mxu0 %v786_v56  ;;  %vm1988_vm9 = vmpackc.low %vm697_vm7, %vm697_vm7  ;;  %v784_v13 = vpack.c.b16 %v773_v5, %v772_v4  ;;  %v771_v15 = vunpack.c.l.b16 %v731_v7  ;;  %v728_v16 = vsel %vm1982_vm8, %v656_v9, 0 }
 0x130   : > { %v729_v17 = vsel %vm1988_vm9, %v657_v10, 0  ;;  %vm1999_vm12 = vmpackc.low %vm694_vm10, %vm694_vm10  ;;  %v768_v27 = vunpack.c.l.b16 %v728_v16 }
 0x131   : > { %vm2005_vm13 = vmpackc.low %vm695_vm11, %vm695_vm11  ;;  %v783_v26 = vpack.c.b16 %v771_v15, %v770_v14  ;;  %v769_v28 = vunpack.c.l.b16 %v729_v17  ;;  %v726_v29 = vsel %vm1999_vm12, %v654_v19, 0 }
 0x132   : > { %v727_v30 = vsel %vm2005_vm13, %v655_v23, 0  ;;  %vm708_vm0 = vmpackc.low %vm692_vm14, %vm692_vm14  ;;  %v766_v21 = vunpack.c.l.b16 %v726_v29 }
 0x133   : > { %798 = vmatpush.bf16.msra.mxu0 %v785_v3  ;;  %vm709_vm1 = vmpackc.low %vm693_vm15, %vm693_vm15  ;;  %v782_v20 = vpack.c.b16 %v769_v28, %v768_v27  ;;  %v767_v33 = vunpack.c.l.b16 %v727_v30  ;;  %v724_v34 = vsel %vm708_vm0, %v652_v31, 0 }
 0x134   : > { %v725_v35 = vsel %vm709_vm1, %v653_v32, 0  ;;  %vm689_vm3 = vmpackc.low %vm688_vm2, %vm688_vm2  ;;  %v764_v38 = vunpack.c.l.b16 %v724_v34 }
 0x135   : > { %v781_v39 = vpack.c.b16 %v767_v33, %v766_v21  ;;  %v765_v40 = vunpack.c.l.b16 %v725_v35  ;;  %v690_v41 = vsel %vm689_vm3, %v650_v36, 0  ;;  %v691_v42 = vsel %vm689_vm3, %v651_v37, 0 }
 0x136   : > { %v744_v22 = vunpack.c.l.b16 %v690_v41  ;;  %v745_v43 = vunpack.c.l.b16 %v691_v42 }
 0x137   : > { %799 = vmatpush.bf16.msra.mxu0 %v784_v13  ;;  %v780_v44 = vpack.c.b16 %v765_v40, %v764_v38 }
 0x138   : > { %v746_v45 = vpack.c.b16 %v745_v43, %v744_v22 }
 0x13b   : > { %800 = vmatpush.bf16.msra.mxu0 %v783_v26 }
 0x13f   : > { %801 = vmatpush.bf16.msra.mxu0 %v782_v20 }
 0x143   : > { %802 = vmatpush.bf16.msra.mxu0 %v781_v39 }
 0x147   : > { %803 = vmatpush.bf16.msra.mxu0 %v780_v44 }
 0x14a   : > { %804 = vmatmul.bf16.vlgmr.msra.gmra.mxu0 %v746_v45 }
 0x1c7   : > { %v805_v47 = vpop.f32.mrf.mxu0 }
 0x1c8   : > { %v810_v48 = vadd.f32 %v805_v47, %v740_v46 }
 0x1ca   : > { %813 = vst.msk [vmem:[%s1881_s15] sm:$0xff] %vm812_vm4, %v810_v48 }
 0x1cf   : > { %v807_v50 = vpop.f32.mrf.mxu0 }
 0x1d0   : > { %v811_v51 = vadd.f32 %v807_v50, %v741_v49 }
 0x1d2   : > { %814 = vst.msk [vmem:[%s1881_s15 + $0x8] sm:$0xff] %vm812_vm4, %v811_v51 }
 0x1d3 PF: > { %p816_p7 = scmp.lt.s32.totalorder %s1865_s16, 200  ;;  %p817_p5 = scmp.gt.s32.totalorder %s545_s0, 200 }
 0x1d5   : > { %p2029_p8 = pnand %p817_p5, %p816_p7  ;;  %822 = sbr.rel (%p817_p5) target bundleno = 643 (0x283), region = 134 }
 0x1da   : > { %v1407_v52 = vld [vmem:[%s1875_s1 + $0x38] sm:$0xff]  ;;  %v1406_v53 = vld [vmem:[%s1875_s1 + $0x30] sm:$0xff]  ;;  %v1405_v54 = vld [vmem:[%s1875_s1 + $0x28] sm:$0xff]  ;;  %vm913_vm5 = vcmask 261120  }
 0x1db   : > { %897 = vmatpush.bf16.msra.mxu0 %v1407_v52  ;;  %v1404_v55 = vld [vmem:[%s1875_s1 + $0x20] sm:$0xff]  ;;  %v1403_v56 = vld [vmem:[%s1875_s1 + $0x18] sm:$0xff]  ;;  %v1402_v57 = vld [vmem:[%s1875_s1 + $0x10] sm:$0xff] }
 0x1dc   : > { %v1401_v58 = vld [vmem:[%s1875_s1 + $0x8] sm:$0xff]  ;;  %v1400_v59 = vld [vmem:[%s1875_s1] sm:$0xff]  ;;  %v1399_v60 = vld [vmem:[%s1879_s9] sm:$0xff] }
 0x1dd   : > { %v823_v61 = vld [vmem:[%s1883_s27] sm:$0xff]  ;;  %v824_v0 = vld [vmem:[%s1883_s27 + $0x8] sm:$0xff] }
 0x1df   : > { %898 = vmatpush.bf16.msra.mxu0 %v1406_v53 }
 0x1e3   : > { %899 = vmatpush.bf16.msra.mxu0 %v1405_v54 }
 0x1e7   : > { %900 = vmatpush.bf16.msra.mxu0 %v1404_v55 }
 0x1eb   : > { %901 = vmatpush.bf16.msra.mxu0 %v1403_v56 }
 0x1ef   : > { %902 = vmatpush.bf16.msra.mxu0 %v1402_v57 }
 0x1f3   : > { %903 = vmatpush.bf16.msra.mxu0 %v1401_v58 }
 0x1f7   : > { %904 = vmatpush.bf16.msra.mxu0 %v1400_v59 }
 0x1fa   : > { %905 = vmatmul.bf16.vlgmr.msra.gmra.mxu0 %v1399_v60 }
 0x277   : > { %v906_v62 = vpop.f32.mrf.mxu0 }
 0x278   : > { %v911_v63 = vadd.f32 %v906_v62, %v823_v61 }
 0x27a   : > { %914 = vst.msk [vmem:[%s1883_s27] sm:$0xff] %vm913_vm5, %v911_v63 }
 0x27f   : > { %v908_v1 = vpop.f32.mrf.mxu0 }
 0x280   : > { %v912_v2 = vadd.f32 %v908_v1, %v824_v0 }
 0x282   : > { %915 = vst.msk [vmem:[%s1883_s27 + $0x8] sm:$0xff] %vm913_vm5, %v912_v2 }
 0x283 PF: > { %917 = sbr.rel (%p2029_p8) target bundleno = 830 (0x33e), region = 138  ;;  %s918_s7 = ssub.s32 (!%p2029_p8), 200, %s1865_s16 }
 0x288   : > { %v937_v3 = vlaneseq  ;;  %v2052_v5 = vstv %s918_s7  ;;  %v935_v10 = vld [vmem:[%s1875_s1 + $0x38] sm:$0xf]  ;;  %v936_v13 = vld [vmem:[%s1875_s1 + $0x3c] sm:$0xf]  ;;  %v933_v15 = vld [vmem:[%s1875_s1 + $0x30] sm:$0xf] }
 0x289   : > { %v934_v18 = vld [vmem:[%s1875_s1 + $0x34] sm:$0xf]  ;;  %v931_v25 = vld [vmem:[%s1875_s1 + $0x28] sm:$0xf]  ;;  %v932_v29 = vld [vmem:[%s1875_s1 + $0x2c] sm:$0xf] }
 0x28a   : > { %v2050_v4 = vshrl.u32 %v937_v3, 7  ;;  %v929_v35 = vld [vmem:[%s1875_s1 + $0x20] sm:$0xf]  ;;  %v930_v36 = vld [vmem:[%s1875_s1 + $0x24] sm:$0xf] }
 0x28b   : > { %v927_v45 = vld [vmem:[%s1875_s1 + $0x18] sm:$0xf]  ;;  %v928_v46 = vld [vmem:[%s1875_s1 + $0x1c] sm:$0xf]  ;;  %v925_v56 = vld [vmem:[%s1875_s1 + $0x10] sm:$0xf] }
 0x28c   : > { %v954_v6 = vadd.s32 112, %v2050_v4  ;;  %v955_v7 = vadd.s32 120, %v2050_v4  ;;  %v952_v8 = vadd.s32 96, %v2050_v4  ;;  %v953_v9 = vadd.s32 104, %v2050_v4  ;;  %v926_v57 = vld [vmem:[%s1875_s1 + $0x14] sm:$0xf] }
 0x28d   : > { %v950_v11 = vadd.s32 80, %v2050_v4  ;;  %v951_v12 = vadd.s32 88, %v2050_v4  ;;  %v948_v14 = vadd.s32 64, %v2050_v4  ;;  %v949_v16 = vadd.s32 72, %v2050_v4  ;;  %v923_v2 = vld [vmem:[%s1875_s1 + $0x8] sm:$0xf] }
 0x28e   : > { %vm975_vm6 = vcmp.lt.s32.totalorder %v954_v6, %v2052_v5  ;;  %vm976_vm7 = vcmp.lt.s32.totalorder %v955_v7, %v2052_v5  ;;  %vm973_vm8 = vcmp.lt.s32.totalorder %v952_v8, %v2052_v5  ;;  %vm974_vm10 = vcmp.lt.s32.totalorder %v953_v9, %v2052_v5  ;;  %v924_v6 = vld [vmem:[%s1875_s1 + $0xc] sm:$0xf]  ;;  %v1009_v32 = vld [vmem:[%s1883_s27] sm:$0xff] }
 0x28f   : > { %vm991_vm9 = vmpackc.low %vm975_vm6, %vm975_vm6  ;;  %vm971_vm12 = vcmp.lt.s32.totalorder %v950_v11, %v2052_v5  ;;  %v946_v19 = vadd.s32 48, %v2050_v4  ;;  %vm972_vm14 = vcmp.lt.s32.totalorder %v951_v12, %v2052_v5  ;;  %v947_v26 = vadd.s32 56, %v2050_v4 }
 0x290   : > { %vm992_vm11 = vmpackc.low %vm976_vm7, %vm976_vm7  ;;  %v1007_v17 = vsel %vm991_vm9, %v935_v10, 0  ;;  %vm969_vm0 = vcmp.lt.s32.totalorder %v948_v14, %v2052_v5  ;;  %vm970_vm2 = vcmp.lt.s32.totalorder %v949_v16, %v2052_v5  ;;  %v944_v20 = vadd.s32 32, %v2050_v4  ;;  %v921_v14 = vld [vmem:[%s1875_s1] sm:$0xf] }
 0x291   : > { %v1008_v23 = vsel %vm992_vm11, %v936_v13, 0  ;;  %v1047_v24 = vunpack.c.l.b16 %v1007_v17  ;;  %vm989_vm13 = vmpackc.low %vm973_vm8, %vm973_vm8  ;;  %vm967_vm4 = vcmp.lt.s32.totalorder %v946_v19, %v2052_v5  ;;  %vm968_vm6 = vcmp.lt.s32.totalorder %v947_v26, %v2052_v5  ;;  %v919_v19 = vld [vmem:[%s1879_s9] sm:$0xf] }
 0x292   : > { %v1048_v27 = vunpack.c.l.b16 %v1008_v23  ;;  %vm990_vm15 = vmpackc.low %vm974_vm10, %vm974_vm10  ;;  %v1005_v28 = vsel %vm989_vm13, %v933_v15, 0  ;;  %v945_v39 = vadd.s32 40, %v2050_v4  ;;  %vm965_vm10 = vcmp.lt.s32.totalorder %v944_v20, %v2052_v5  ;;  %v922_v15 = vld [vmem:[%s1875_s1 + $0x4] sm:$0xf]  ;;  %v920_v23 = vld [vmem:[%s1879_s9 + $0x4] sm:$0xf] }
 0x293   : > { %v1006_v30 = vsel %vm990_vm15, %v934_v18, 0  ;;  %v1045_v31 = vunpack.c.l.b16 %v1005_v28  ;;  %vm2077_vm1 = vmpackc.low %vm971_vm12, %vm971_vm12  ;;  %v942_v48 = vadd.s32 16, %v2050_v4  ;;  %v943_v49 = vadd.s32 24, %v2050_v4 }
 0x294   : > { %v1056_v21 = vpack.c.b16 %v1048_v27, %v1047_v24  ;;  %v1046_v33 = vunpack.c.l.b16 %v1006_v30  ;;  %vm988_vm3 = vmpackc.low %vm972_vm14, %vm972_vm14  ;;  %v1003_v34 = vsel %vm2077_vm1, %v931_v25, 0  ;;  %vm966_vm11 = vcmp.lt.s32.totalorder %v945_v39, %v2052_v5 }
 0x295   : > { %v1004_v37 = vsel %vm988_vm3, %v932_v29, 0  ;;  %vm2088_vm5 = vmpackc.low %vm969_vm0, %vm969_vm0  ;;  %v1043_v41 = vunpack.c.l.b16 %v1003_v34  ;;  %vm963_vm14 = vcmp.lt.s32.totalorder %v942_v48, %v2052_v5  ;;  %vm964_vm15 = vcmp.lt.s32.totalorder %v943_v49, %v2052_v5 }
 0x296   : > { %1065 = vmatpush.bf16.msra.mxu0 %v1056_v21  ;;  %v1055_v40 = vpack.c.b16 %v1046_v33, %v1045_v31  ;;  %v1044_v42 = vunpack.c.l.b16 %v1004_v37  ;;  %vm986_vm7 = vmpackc.low %vm970_vm2, %vm970_vm2  ;;  %v1001_v22 = vsel %vm2088_vm5, %v929_v35, 0  ;;  %v941_v59 = vadd.s32 8, %v2050_v4  ;;  %v1010_v33 = vld [vmem:[%s1883_s27 + $0x8] sm:$0xff] }
 0x297   : > { %v1002_v43 = vsel %vm986_vm7, %v930_v36, 0  ;;  %vm2099_vm8 = vmpackc.low %vm967_vm4, %vm967_vm4  ;;  %v1041_v51 = vunpack.c.l.b16 %v1001_v22  ;;  %vm961_vm2 = vcmp.lt.s32.totalorder %v2050_v4, %v2052_v5  ;;  %v938_v8 = vand.u32 127, %v937_v3 }
 0x298   : > { %vm2105_vm9 = vmpackc.low %vm968_vm6, %vm968_vm6  ;;  %v1054_v50 = vpack.c.b16 %v1044_v42, %v1043_v41  ;;  %v1042_v52 = vunpack.c.l.b16 %v1002_v43  ;;  %v999_v53 = vsel %vm2099_vm8, %v927_v45, 0  ;;  %vm962_vm3 = vcmp.lt.s32.totalorder %v941_v59, %v2052_v5 }
 0x299   : > { %v1000_v54 = vsel %vm2105_vm9, %v928_v46, 0  ;;  %vm2117_vm12 = vmpackc.low %vm965_vm10, %vm965_vm10  ;;  %v1039_v61 = vunpack.c.l.b16 %v999_v53  ;;  %vm957_vm6 = vcmp.lt.s32.totalorder %v938_v8, %v2052_v5  ;;  %vm1081_vm8 = vcmask 261120  }
 0x29a   : > { %1066 = vmatpush.bf16.msra.mxu0 %v1055_v40  ;;  %vm2123_vm13 = vmpackc.low %vm966_vm11, %vm966_vm11  ;;  %v1053_v60 = vpack.c.b16 %v1042_v52, %v1041_v51  ;;  %v1040_v62 = vunpack.c.l.b16 %v1000_v54  ;;  %v997_v63 = vsel %vm2117_vm12, %v925_v56, 0 }
 0x29b   : > { %v998_v0 = vsel %vm2123_vm13, %v926_v57, 0  ;;  %vm2134_vm0 = vmpackc.low %vm963_vm14, %vm963_vm14  ;;  %v1037_v10 = vunpack.c.l.b16 %v997_v63 }
 0x29c   : > { %vm2140_vm1 = vmpackc.low %vm964_vm15, %vm964_vm15  ;;  %v1052_v9 = vpack.c.b16 %v1040_v62, %v1039_v61  ;;  %v1038_v11 = vunpack.c.l.b16 %v998_v0  ;;  %v995_v12 = vsel %vm2134_vm0, %v923_v2, 0 }
 0x29d   : > { %v996_v13 = vsel %vm2140_vm1, %v924_v6, 0  ;;  %vm977_vm4 = vmpackc.low %vm961_vm2, %vm961_vm2  ;;  %v1035_v4 = vunpack.c.l.b16 %v995_v12 }
 0x29e   : > { %1067 = vmatpush.bf16.msra.mxu0 %v1054_v50  ;;  %vm978_vm5 = vmpackc.low %vm962_vm3, %vm962_vm3  ;;  %v1051_v3 = vpack.c.b16 %v1038_v11, %v1037_v10  ;;  %v1036_v16 = vunpack.c.l.b16 %v996_v13  ;;  %v993_v17 = vsel %vm977_vm4, %v921_v14, 0 }
 0x29f   : > { %v994_v18 = vsel %vm978_vm5, %v922_v15, 0  ;;  %vm958_vm7 = vmpackc.low %vm957_vm6, %vm957_vm6  ;;  %v1033_v24 = vunpack.c.l.b16 %v993_v17 }
 0x2a0   : > { %v1050_v25 = vpack.c.b16 %v1036_v16, %v1035_v4  ;;  %v1034_v26 = vunpack.c.l.b16 %v994_v18  ;;  %v959_v27 = vsel %vm958_vm7, %v919_v19, 0  ;;  %v960_v28 = vsel %vm958_vm7, %v920_v23, 0 }
 0x2a1   : > { %v1013_v5 = vunpack.c.l.b16 %v959_v27  ;;  %v1014_v29 = vunpack.c.l.b16 %v960_v28 }
 0x2a2   : > { %1068 = vmatpush.bf16.msra.mxu0 %v1053_v60  ;;  %v1049_v30 = vpack.c.b16 %v1034_v26, %v1033_v24 }
 0x2a3   : > { %v1015_v31 = vpack.c.b16 %v1014_v29, %v1013_v5 }
 0x2a6   : > { %1069 = vmatpush.bf16.msra.mxu0 %v1052_v9 }
 0x2aa   : > { %1070 = vmatpush.bf16.msra.mxu0 %v1051_v3 }
 0x2ae   : > { %1071 = vmatpush.bf16.msra.mxu0 %v1050_v25 }
 0x2b2   : > { %1072 = vmatpush.bf16.msra.mxu0 %v1049_v30 }
 0x2b5   : > { %1073 = vmatmul.bf16.vlgmr.msra.gmra.mxu0 %v1015_v31 }
 0x332   : > { %v1074_v20 = vpop.f32.mrf.mxu0 }
 0x333   : > { %v1079_v21 = vadd.f32 %v1074_v20, %v1009_v32 }
 0x335   : > { %1082 = vst.msk [vmem:[%s1883_s27] sm:$0xff] %vm1081_vm8, %v1079_v21 }
 0x33a   : > { %v1076_v34 = vpop.f32.mrf.mxu0 }
 0x33b   : > { %v1080_v35 = vadd.f32 %v1076_v34, %v1010_v33 }
 0x33d   : > { %1083 = vst.msk [vmem:[%s1883_s27 + $0x8] sm:$0xff] %vm1081_vm8, %v1080_v35 }
 0x33e PF: > { %s1408_s1 = sshll.u32 %s1667_s26, 4  ;;  %s2300_s13 = sld [smem:[#allocation20_spill]] }
 0x33f   : > { %s1102_s21 = sshll.u32 %s1881_s15, 4  ;;  %s1085_s4 = scalar_lea.sflag [#allocation5], %s1860_s28  ;;  %s1103_s21 = int_to_ptr.vmem [resolvable:$true] %s1102_s21 }
 0x344   : > { %s1101_s12 = scalar_lea.hbm %s2300_s13, %s1408_s1  ;;  %s1541_s26 = scalar_lea.hbm %s2300_s13, 32 }
 0x345   : > { %s1104_s23 = sshll.u32 %s1101_s12, 4  ;;  %s1105_s23 = int_to_ptr.hbm [resolvable:$true] %s1104_s23 }
 0x346   : > { %s1535_s5 = sshra.s32 %s1105_s23, 4  ;;  %s1536_s5 = int_to_ptr.hbm [resolvable:$true] %s1535_s5 }
 0x347   : > { %s1537_s10 = scalar_lea.hbm %s1536_s5, 16  ;;  %p1542_p12 = scmp.lt.s32.totalorder %s1536_s5, %s2300_s13 }
 0x348   : > { %p1538_p9 = scmp.ne.s32.totalorder %s1536_s5, %s1537_s10  ;;  %p1543_p13 = scmp.lt.s32.totalorder %s1541_s26, %s1537_s10 }
 0x34a   : > { %p1539_p10 = pnand %p1538_p9, %p1828_p2  ;;  %p1544_p0 = por %p1543_p13, %p1542_p12 }
 0x34c   : > { %p1540_p11 = pneg %p1539_p10 }
 0x34e   : > { %p1545_p1 = pnand %p1544_p0, %p1540_p11 }
 0x350   : > { %1548 = shalt.err (!%p1545_p1)
}
 0x351   : > { %s1682_s15 = smov 128   ;;  %s1683_s25 = smov 8  }
 0x352   : > { %1410 = dma.vmem_to_hbm [thread:$0]  (%p1828_p2), %s1103_s21, 256, %s1105_s23, %s1085_s4, %s1682_s15, %s1682_s15, %s1683_s25  }
 0x353   : > { %s2301_s7 = sld [smem:[#allocation21_spill]]  ;;  %s1119_s16 = sshll.u32 %s1883_s27, 4  ;;  %s1120_s16 = int_to_ptr.vmem [resolvable:$true] %s1119_s16 }
 0x354   : > { %s1090_s5 = scalar_lea.sflag [#allocation7], %s1860_s28 }
 0x359   : > { %s1118_s11 = scalar_lea.hbm %s2301_s7, %s1408_s1  ;;  %s1569_s21 = scalar_lea.hbm %s2301_s7, 32 }
 0x35a   : > { %s1121_s12 = sshll.u32 %s1118_s11, 4  ;;  %s1122_s12 = int_to_ptr.hbm [resolvable:$true] %s1121_s12 }
 0x35b   : > { %s1563_s10 = sshra.s32 %s1122_s12, 4  ;;  %s1564_s10 = int_to_ptr.hbm [resolvable:$true] %s1563_s10 }
 0x35c   : > { %s1565_s8 = scalar_lea.hbm %s1564_s10, 16  ;;  %p1570_p5 = scmp.lt.s32.totalorder %s1564_s10, %s2301_s7 }
 0x35d   : > { %p1566_p3 = scmp.ne.s32.totalorder %s1564_s10, %s1565_s8  ;;  %p1571_p8 = scmp.lt.s32.totalorder %s1569_s21, %s1565_s8 }
 0x35f   : > { %p1567_p4 = pnand %p1566_p3, %p1828_p2  ;;  %p1572_p9 = por %p1571_p8, %p1570_p5 }
 0x361   : > { %p1568_p7 = pneg %p1567_p4 }
 0x363   : > { %p1573_p10 = pnand %p1572_p9, %p1568_p7 }
 0x365   : > { %1576 = shalt.err (!%p1573_p10)
}
 0x366   : > { %1411 = dma.vmem_to_hbm [thread:$0]  (%p1828_p2), %s1120_s16, 256, %s1122_s12, %s1090_s5, %s1682_s15, %s1682_s15, %s1683_s25  }
 0x367 PF: > { %p1421_p11 = scmp.ge.s32.totalorder %s1679_s29, 2  ;;  %s1136_s27 = sand.u32 1, %s1635_s18  }
 0x368   : > { %s1137_s28 = scalar_lea.sflag [#allocation5], %s1136_s27 }
 0x369   : > { %p1415_p12 = pnand %p1421_p11, %p1836_p6 }
 0x36b   : > { %p1416_p13 = pneg %p1415_p12 }
 0x36d   : > { %1626 = dma.done.wait (%p1416_p13), %s1137_s28, 256  }
 0x36e   : > { %1628 = vsyncadd (%p1416_p13), %s1137_s28, 4294967040  ;;  %s1147_s1 = scalar_lea.sflag [#allocation7], %s1136_s27 }
 0x36f   : > { %1630 = dma.done.wait (%p1416_p13), %s1147_s1, 256  }
 0x370   : > { %1632 = vsyncadd (%p1416_p13), %s1147_s1, 4294967040  ;;  %s22_s29 = sadd.s32 1, %s1679_s29   ;;  %s2302_s17 = sld [smem:[#allocation16_spill]] }
 0x371   : > { %p19_p0 = scmp.ge.s32.totalorder %s22_s29, 6   ;;  %s2303_s23 = sld [smem:[#allocation10_spill]] }
 0x372   : > { %s2304_s24 = sld [smem:[#allocation15_spill]]  ;;  %s2309_s18 = smov %s1639_s19 }
 0x373   : > { %s2305_s25 = sld [smem:[#allocation11_spill]]  ;;  %s2310_s19 = smov %s1643_s20 }
 0x374   : > { %s2306_s26 = sld [smem:[#allocation12_spill]]  ;;  %s2311_s20 = smov %s1826_s3 }
 0x375   : > { %s2307_s27 = sld [smem:[#allocation13_spill]]  ;;  %s2312_s21 = smov %s1651_s22 }
 0x376   : > { %s2308_s28 = sld [smem:[#allocation14_spill]]  ;;  %s2313_s22 = smov %s2302_s17 }
 0x377   :  { %21 = sbr.rel (!%p19_p0) target bundleno = 15 (0xf), region = 209 }
 0x37c   :  { %1153 = vsyncpa [#allocation5], 1 }
 0x37d   :  { %1155 = vsyncpa [#allocation5 + $0x1], 1 }
 0x37e   :  { %1156 = vsyncpa [#allocation7], 1 }
 0x37f   :  { %1158 = vsyncpa [#allocation7 + $0x1], 1 }

</bundles_post_ra>
